<compile_context>
chip_gen: v7x
topology: tpu7x:2x2x1
jax: 0.10.0
libtpu: 0.0.40
codegen_flags: <defaults>
</compile_context>

<pallas_src>
import jax
import jax.numpy as jnp
from jax.experimental import pallas as pl
from jax.experimental.pallas import tpu as pltpu


def transition_up_kernel(x_ref, halo_ref, w_ref, b_ref, out_ref):
    """One (batch n, row-tile h) grid step.

    x_ref    : (TH*(W+1), Cin)   flattened pixels of TH input rows
                                 (row-major, incl. the right zero-pad column)
    halo_ref : (W+1, Cin)        the input row just below the tile
                                 (all-zero row below the last image row)
    w_ref    : (4, Cin, 4*Cout)  tap weights per pixel-shift group
                                 (group g: 0=(i,j) 1=(i,j+1) 2=(i+1,j) 3=(i+1,j+1);
                                  lanes are quadrant-major: q = 2a+b)
    b_ref    : (1, 4*Cout)       bias, tiled once per output quadrant
    out_ref  : (TH*(W+1), 4*Cout) sub-pixel outputs (pad column discarded later)
    """
    P, Cin = x_ref.shape
    Wp = halo_ref.shape[0]

    # Extend the tile with the halo row (and one zero row so every static
    # slice below is in-bounds); neighbour pixels are then plain row shifts
    # of the flattened-pixel matrix.
    ext = jnp.concatenate(
        [x_ref[...], halo_ref[...], jnp.zeros((1, Cin), x_ref.dtype)], axis=0)

    # Shift-group offsets in flat-pixel rows: (i,j)->0, (i,j+1)->1,
    # (i+1,j)->Wp, (i+1,j+1)->Wp+1.  One fused (P, Cin) @ (Cin, 4*Cout) MXU
    # matmul per group; f32 accumulation.
    acc = jnp.dot(ext[0:P, :], w_ref[0], preferred_element_type=jnp.float32)
    for g, off in ((1, 1), (2, Wp), (3, Wp + 1)):
        acc = acc + jnp.dot(ext[off:off + P, :], w_ref[g],
                            preferred_element_type=jnp.float32)

    # Single lane-dense store of all 4 sub-pixels.
    out_ref[...] = acc + b_ref[...]


def _build_subpixel_weight(weight):
    """Pack the PyTorch (Cin, Cout, 3, 3) ConvTranspose2d weight into
    (4, Cin, 4*Cout): row-group g = which neighbouring input pixel is used,
    lane-group q = 2a+b = which output sub-pixel is produced."""
    w = weight.astype(jnp.float32)
    Cin, Cout = w.shape[0], w.shape[1]
    zero = jnp.zeros((Cin, Cout), jnp.float32)
    groups = []
    for g in range(4):
        cols = []
        for a in range(2):
            for b in range(2):
                if g == 0:
                    blk = w[:, :, a + 1, b + 1]
                elif g == 1:
                    blk = w[:, :, a + 1, 0] if b == 1 else zero
                elif g == 2:
                    blk = w[:, :, 0, b + 1] if a == 1 else zero
                else:
                    blk = w[:, :, 0, 0] if (a == 1 and b == 1) else zero
                cols.append(blk)
        groups.append(jnp.concatenate(cols, axis=1))      # (Cin, 4*Cout)
    return jnp.stack(groups, axis=0)                      # (4, Cin, 4*Cout)


def _pick_tile_h(H, W, max_rows=2048):
    """Largest row-tile whose flat pixel count is sublane-aligned and <= ~2K rows."""
    Wp = W + 1
    best = None
    for d in range(1, H + 1):
        if H % d == 0 and (d * Wp) % 8 == 0 and d * Wp <= max_rows:
            best = d
    return best if best is not None else H


def transition_up(x_nchw, weight, bias, *, tile_h=None):
    """Forward pass of TransitionUp.

    x_nchw : (N, Cin, H, W) f32
    weight : (Cin, Cout, 3, 3)  (PyTorch ConvTranspose2d layout)
    bias   : (Cout,)
    returns (N, Cout, 2H, 2W) f32
    """
    N, Cin, H, W = x_nchw.shape
    Cout = weight.shape[1]
    Wp = W + 1

    TH = _pick_tile_h(H, W) if tile_h is None else tile_h
    assert H % TH == 0, (H, TH)
    assert (TH * Wp) % 8 == 0 or TH == H, (TH, Wp)
    P = TH * Wp

    # ---- layout glue (wrapper): NCHW -> NHWC, +1 zero row / column ----------
    x = jnp.transpose(x_nchw, (0, 2, 3, 1)).astype(jnp.float32)   # (N, H, W, Cin)
    xp = jnp.pad(x, ((0, 0), (0, 1), (0, 1), (0, 0)))             # (N, H+1, W+1, Cin)
    x_main = xp[:, :H].reshape(N, H * Wp, Cin)                    # flat pixels
    halo = xp[:, TH::TH]                                          # (N, H//TH, W+1, Cin)

    w_packed = _build_subpixel_weight(weight)                     # (4, Cin, 4*Cout)
    bias4 = jnp.tile(bias.astype(jnp.float32).reshape(1, Cout), (1, 4))  # (1, 4*Cout)

    grid = (N, H // TH)
    out_flat = pl.pallas_call(
        transition_up_kernel,
        out_shape=jax.ShapeDtypeStruct((N, H * Wp, 4 * Cout), jnp.float32),
        grid=grid,
        in_specs=[
            # raw input tile (no im2col): TH rows of flattened pixels
            pl.BlockSpec((None, P, Cin), lambda n, h: (n, h, 0)),
            # 1-row halo below the tile (pre-gathered rows TH, 2TH, ..., H)
            pl.BlockSpec((None, None, Wp, Cin), lambda n, h: (n, h, 0, 0)),
            # packed weights / bias stay resident in VMEM across the grid
            pl.BlockSpec((4, Cin, 4 * Cout), lambda n, h: (0, 0, 0)),
            pl.BlockSpec((1, 4 * Cout), lambda n, h: (0, 0)),
        ],
        out_specs=pl.BlockSpec((None, P, 4 * Cout), lambda n, h: (n, h, 0)),
        compiler_params=pltpu.CompilerParams(
            dimension_semantics=("parallel", "parallel"),  # megacore on v7x
            vmem_limit_bytes=32 * 1024 * 1024,
        ),
    )(x_main, halo, w_packed, bias4)

    # ---- layout glue (wrapper): drop pad column, depth-to-space, to NCHW ----
    o = out_flat.reshape(N, H, Wp, 2, 2, Cout)[:, :, :W]          # (N,H,W,a,b,C)
    o = jnp.transpose(o, (0, 1, 3, 2, 4, 5)).reshape(N, 2 * H, 2 * W, Cout)
    return jnp.transpose(o, (0, 3, 1, 2))


def reference(x_nchw, weight, bias):
    """Pure-JAX reference: ConvTranspose2d(k=3, s=2, p=1, op=1) via the
    dilated-convolution identity (PyTorch-exact semantics)."""
    w = weight[:, :, ::-1, ::-1]                  # flip spatial taps
    w = jnp.transpose(w, (1, 0, 2, 3))            # (Cout, Cin, 3, 3) OIHW
    y = jax.lax.conv_general_dilated(
        x_nchw.astype(jnp.float32), w.astype(jnp.float32),
        window_strides=(1, 1),
        padding=((1, 2), (1, 2)),
        lhs_dilation=(2, 2),
        dimension_numbers=('NCHW', 'OIHW', 'NCHW'))
    return y + bias.reshape(1, -1, 1, 1)


if __name__ == "__main__":
    key = jax.random.PRNGKey(0)
    kx, kw, kb = jax.random.split(key, 3)

    N, Cin, H, W = 2, 4, 16, 16      # batch=2, in_channels=4, spatial=16
    Cout = 8                         # out_channels=8

    x = jax.random.normal(kx, (N, Cin, H, W), jnp.float32)
    # PyTorch ConvTranspose2d weight layout: (in_channels, out_channels, kH, kW)
    weight = jax.random.normal(kw, (Cin, Cout, 3, 3), jnp.float32) / jnp.sqrt(9.0 * Cin)
    bias = 0.1 * jax.random.normal(kb, (Cout,), jnp.float32)

    out = transition_up(x, weight, bias, tile_h=8)   # 2 row-tiles/image: exercises halo path
    jax.block_until_ready(out)

    ref = reference(x, weight, bias)
    assert out.shape == (N, Cout, 2 * H, 2 * W), out.shape
    max_err = float(jnp.max(jnp.abs(out - ref)))
    assert jnp.allclose(out, ref, atol=1e-3, rtol=1e-3), max_err

    print("KERNEL_OK")
</pallas_src>

<mosaic_0001>
module attributes {stable_mosaic.version = 11 : i64} {
  func.func @transition_up_kernel(%arg0: i32, %arg1: i32, %arg2: memref<1x136x4xf32, #tpu.memory_space<vmem>>, %arg3: memref<1x1x17x4xf32, #tpu.memory_space<vmem>>, %arg4: memref<4x4x32xf32, #tpu.memory_space<vmem>>, %arg5: memref<1x32xf32, #tpu.memory_space<vmem>>, %arg6: memref<1x136x32xf32, #tpu.memory_space<vmem>>) attributes {dimension_semantics = [#tpu.dimension_semantics<parallel>, #tpu.dimension_semantics<parallel>], iteration_bounds = array<i64: 2, 2>, scalar_prefetch = 0 : i64, scratch_operands = 0 : i64, tpu.core_type = #tpu.core_type<tc>, window_params = [{transform_indices = @transform_0, window_bounds = array<i64: 1, 136, 4>}, {transform_indices = @transform_1, window_bounds = array<i64: 1, 1, 17, 4>}, {pipeline_mode = #tpu.pipeline_mode<synchronous>, transform_indices = @transform_2, window_bounds = array<i64: 4, 4, 32>}, {pipeline_mode = #tpu.pipeline_mode<synchronous>, transform_indices = @transform_3, window_bounds = array<i64: 1, 32>}, {transform_indices = @transform_4, window_bounds = array<i64: 1, 136, 32>}]} {
    %c0 = arith.constant 0 : index
    %c0_0 = arith.constant 0 : index
    %c0_1 = arith.constant 0 : index
    %0 = vector.load %arg2[%c0, %c0_0, %c0_1] : memref<1x136x4xf32, #tpu.memory_space<vmem>>, vector<1x136x4xf32>
    %1 = vector.shape_cast %0 : vector<1x136x4xf32> to vector<136x4xf32>
    %c0_2 = arith.constant 0 : index
    %c0_3 = arith.constant 0 : index
    %c0_4 = arith.constant 0 : index
    %c0_5 = arith.constant 0 : index
    %2 = vector.load %arg3[%c0_2, %c0_3, %c0_4, %c0_5] : memref<1x1x17x4xf32, #tpu.memory_space<vmem>>, vector<1x1x17x4xf32>
    %3 = vector.shape_cast %2 : vector<1x1x17x4xf32> to vector<17x4xf32>
    %cst = arith.constant 0.000000e+00 : f32
    %4 = vector.broadcast %cst : f32 to vector<1x4xf32>
    %5 = tpu.concatenate %1, %3, %4 in 0 : vector<136x4xf32>, vector<17x4xf32>, vector<1x4xf32> -> vector<154x4xf32>
    %6 = vector.extract_strided_slice %5 {offsets = [0, 0], sizes = [136, 4], strides = [1, 1]} : vector<154x4xf32> to vector<136x4xf32>
    %c0_6 = arith.constant 0 : index
    %c0_7 = arith.constant 0 : index
    %c0_8 = arith.constant 0 : index
    %7 = vector.load %arg4[%c0_6, %c0_7, %c0_8] : memref<4x4x32xf32, #tpu.memory_space<vmem>>, vector<1x4x32xf32>
    %8 = vector.shape_cast %7 : vector<1x4x32xf32> to vector<4x32xf32>
    %cst_9 = arith.constant dense<0.000000e+00> : vector<136x32xf32>
    %9 = tpu.matmul %6, %8, %cst_9 {dimension_numbers = #tpu.dot_dimension_numbers<[1], [0], [0], [1], [0, 0, 1, 1], [], []>} : vector<136x4xf32>, vector<4x32xf32>, vector<136x32xf32> -> vector<136x32xf32>
    %10 = vector.extract_strided_slice %5 {offsets = [1, 0], sizes = [136, 4], strides = [1, 1]} : vector<154x4xf32> to vector<136x4xf32>
    %c1 = arith.constant 1 : index
    %c0_10 = arith.constant 0 : index
    %c0_11 = arith.constant 0 : index
    %11 = vector.load %arg4[%c1, %c0_10, %c0_11] : memref<4x4x32xf32, #tpu.memory_space<vmem>>, vector<1x4x32xf32>
    %12 = vector.shape_cast %11 : vector<1x4x32xf32> to vector<4x32xf32>
    %cst_12 = arith.constant dense<0.000000e+00> : vector<136x32xf32>
    %13 = tpu.matmul %10, %12, %cst_12 {dimension_numbers = #tpu.dot_dimension_numbers<[1], [0], [0], [1], [0, 0, 1, 1], [], []>} : vector<136x4xf32>, vector<4x32xf32>, vector<136x32xf32> -> vector<136x32xf32>
    %14 = arith.addf %9, %13 : vector<136x32xf32>
    %15 = vector.extract_strided_slice %5 {offsets = [17, 0], sizes = [136, 4], strides = [1, 1]} : vector<154x4xf32> to vector<136x4xf32>
    %c2 = arith.constant 2 : index
    %c0_13 = arith.constant 0 : index
    %c0_14 = arith.constant 0 : index
    %16 = vector.load %arg4[%c2, %c0_13, %c0_14] : memref<4x4x32xf32, #tpu.memory_space<vmem>>, vector<1x4x32xf32>
    %17 = vector.shape_cast %16 : vector<1x4x32xf32> to vector<4x32xf32>
    %cst_15 = arith.constant dense<0.000000e+00> : vector<136x32xf32>
    %18 = tpu.matmul %15, %17, %cst_15 {dimension_numbers = #tpu.dot_dimension_numbers<[1], [0], [0], [1], [0, 0, 1, 1], [], []>} : vector<136x4xf32>, vector<4x32xf32>, vector<136x32xf32> -> vector<136x32xf32>
    %19 = arith.addf %14, %18 : vector<136x32xf32>
    %20 = vector.extract_strided_slice %5 {offsets = [18, 0], sizes = [136, 4], strides = [1, 1]} : vector<154x4xf32> to vector<136x4xf32>
    %c3 = arith.constant 3 : index
    %c0_16 = arith.constant 0 : index
    %c0_17 = arith.constant 0 : index
    %21 = vector.load %arg4[%c3, %c0_16, %c0_17] : memref<4x4x32xf32, #tpu.memory_space<vmem>>, vector<1x4x32xf32>
    %22 = vector.shape_cast %21 : vector<1x4x32xf32> to vector<4x32xf32>
    %cst_18 = arith.constant dense<0.000000e+00> : vector<136x32xf32>
    %23 = tpu.matmul %20, %22, %cst_18 {dimension_numbers = #tpu.dot_dimension_numbers<[1], [0], [0], [1], [0, 0, 1, 1], [], []>} : vector<136x4xf32>, vector<4x32xf32>, vector<136x32xf32> -> vector<136x32xf32>
    %24 = arith.addf %19, %23 : vector<136x32xf32>
    %c0_19 = arith.constant 0 : index
    %c0_20 = arith.constant 0 : index
    %25 = vector.load %arg5[%c0_19, %c0_20] : memref<1x32xf32, #tpu.memory_space<vmem>>, vector<1x32xf32>
    %26 = vector.broadcast %25 : vector<1x32xf32> to vector<136x32xf32>
    %27 = arith.addf %24, %26 : vector<136x32xf32>
    %c0_21 = arith.constant 0 : index
    %c0_22 = arith.constant 0 : index
    %c0_23 = arith.constant 0 : index
    %28 = vector.load %arg6[%c0_21, %c0_22, %c0_23] : memref<1x136x32xf32, #tpu.memory_space<vmem>>, vector<1x136x32xf32>
    %29 = vector.shape_cast %28 : vector<1x136x32xf32> to vector<136x32xf32>
    %30 = vector.shape_cast %27 : vector<136x32xf32> to vector<1x136x32xf32>
    tpu.vector_store %arg6[%c0_21, %c0_22, %c0_23], %30 {strides = array<i32>} : memref<1x136x32xf32, #tpu.memory_space<vmem>>, vector<1x136x32xf32>,
    return
  }
  func.func @transform_0(%arg0: i32, %arg1: i32) -> (i32, i32, i32) {
    %c0_i32 = arith.constant 0 : i32
    %c0_i32_0 = arith.constant 0 : i32
    return %arg0, %arg1, %c0_i32 : i32, i32, i32
  }
  func.func @transform_1(%arg0: i32, %arg1: i32) -> (i32, i32, i32, i32) {
    %c0_i32 = arith.constant 0 : i32
    %c0_i32_0 = arith.constant 0 : i32
    %c0_i32_1 = arith.constant 0 : i32
    return %arg0, %arg1, %c0_i32, %c0_i32_0 : i32, i32, i32, i32
  }
  func.func @transform_2(%arg0: i32, %arg1: i32) -> (i32, i32, i32) {
    %c0_i32 = arith.constant 0 : i32
    %c0_i32_0 = arith.constant 0 : i32
    %c0_i32_1 = arith.constant 0 : i32
    %c0_i32_2 = arith.constant 0 : i32
    return %c0_i32, %c0_i32_0, %c0_i32_1 : i32, i32, i32
  }
  func.func @transform_3(%arg0: i32, %arg1: i32) -> (i32, i32) {
    %c0_i32 = arith.constant 0 : i32
    %c0_i32_0 = arith.constant 0 : i32
    %c0_i32_1 = arith.constant 0 : i32
    return %c0_i32, %c0_i32_0 : i32, i32
  }
  func.func @transform_4(%arg0: i32, %arg1: i32) -> (i32, i32, i32) {
    %c0_i32 = arith.constant 0 : i32
    %c0_i32_0 = arith.constant 0 : i32
    return %arg0, %arg1, %c0_i32 : i32, i32, i32
  }
}

</mosaic_0001>

<bundles_post_ra>
// kernel: tpu_custom_call.1
= control target key start
LH: loop header
LB: loop body
LE: loop exit
PB: predicated region body
PF: predicated region fallthrough
CT: control target
= control target key end

     0   :  { %s1785_s15 = smov 0   ;;  %s1787_s16 = smov 0   ;;  %s2403_s0 = inlined_call_operand.vmem [shape: f32[2,272,4], index: 0, kind: input, shape index: {}]   ;;  %s2404_s1 = inlined_call_operand.vmem [shape: f32[2,2,17,4], index: 1, kind: input, shape index: {}]   ;;  %s2405_s2 = inlined_call_operand.vmem [shape: f32[4,4,32], index: 2, kind: input, shape index: {}]   ;;  %s2406_s3 = inlined_call_operand.vmem [shape: f32[1,32], index: 3, kind: input, shape index: {}]   ;;  %s2407_s4 = inlined_call_operand.vmem [shape: f32[2,272,32], index: 4, kind: output, shape index: {}]  }
   0x1   :  { %s1789_s17 = smov 0   ;;  %s1791_s18 = smov 0  }
   0x2   :  { %s1793_s19 = smov 0  }
   0x3 LB: > { %s23_s20 = sadd.s32 1, %s1748_s17  ;;  %s26_s21 = sadd.s32 1, %s1752_s18  ;;  %s1756_s19 = sphi %s1793_s19, %s14_s19   ;;  %s1752_s18 = sphi %s1791_s18, %s2411_s18   ;;  %s1748_s17 = sphi %s1789_s17, %s2410_s17   ;;  %s1744_s16 = sphi %s1787_s16, %s2409_s16   ;;  %s1740_s15 = sphi %s1785_s15, %s2408_s15  }
   0x4   : > { %p24_p0 = scmp.ge.s32.totalorder %s23_s20, 2  ;;  %p1307_p1 = scmp.ge.s32.totalorder %s1756_s19, 1 }
   0x5   : > { %p199_p2 = scmp.lt.s32.totalorder %s1756_s19, 5 }
   0x6   : > { %s2413_s20 = smov (%p24_p0, %s23_s20), 0  ;;  %s2415_s21 = smov (!%p24_p0, %s26_s21), %s1752_s18 }
   0x7   : > { %p200_p3 = pnand %p1307_p1, %p199_p2  ;;  %p28_p4 = scmp.ge.s32.totalorder %s2415_s21, 2 }
   0x8   : > { %v1311_v0 = vld [vmem:[%s2405_s2 + $0x4] sm:$0xf] (!%p200_p3)  ;;  %vm385_vm0 = vcmask (!%p200_p3), 1043456   ;;  %s242_s24 = smul.u32 (!%p200_p3), 17, %s1740_s15  ;;  %v1758_v1 = vmov (!%p200_p3), 0.0   ;;  %p243_p5 = scmp.lt.s32.totalorder (!%p200_p3), %s1744_s16, 1 }
   0x9   : > { %s2417_s21 = smov (%p28_p4, %s2415_s21), 0  ;;  %203 = sbr.rel (%p200_p3) target bundleno = 377 (0x179), region = 36 }
   0xa   : > { %1461 = vmatprep.subr.mxu0 (!%p200_p3), %v1758_v1  ;;  %1514 = vmatprep.subr.mxu1 (!%p200_p3), %v1758_v1  ;;  %v293_v2 = vld [vmem:[%s2405_s2] sm:$0xf] (!%p200_p3)  ;;  %vm1759_vm1 = vmmov (!%p200_p3), 0   ;;  %p245_p6 = scmp.lt.s32.totalorder (!%p200_p3), %s242_s24, 33  ;;  %p254_p7 = scmp.lt.s32.totalorder (!%p200_p3), %s1740_s15, 1  ;;  %vm350_vm2 = vcmask (!%p200_p3), 31744  }
   0xb   : > { %1462 = vmatpush3.msk.msra.mxu0 (!%p200_p3), %vm385_vm0, %v1311_v0  ;;  %1463 = vmatprep.mubr.msk.f32.mxu0 (!%p200_p3), %vm1759_vm1, %v1758_v1  ;;  %v1367_v3 = vld [vmem:[%s2405_s2 + $0xc] sm:$0xf] (!%p200_p3)  ;;  %vm314_vm3 = vcmask (!%p200_p3), 1046528   ;;  %v1348_v10 = vld [vmem:[%s2405_s2 + $0x8] sm:$0xf] (!%p200_p3)  ;;  %vm291_vm4 = vcmask (!%p200_p3), 1040384  }
   0xc   : > { %1515 = vmatpush3.msk.msra.mxu1 (!%p200_p3), %vm385_vm0, %v293_v2  ;;  %1516 = vmatprep.mubr.msk.f32.mxu1 (!%p200_p3), %vm1759_vm1, %v1758_v1  ;;  %vm910_vm5 = vcmask (!%p200_p3), 1045504   ;;  %vm1174_vm6 = vcmask (!%p200_p3), 261120  }
   0xd   : > { %1567 = vmatprep.subr.mxu0 (!%p200_p3), %v1758_v1  ;;  %1620 = vmatprep.subr.mxu1 (!%p200_p3), %v1758_v1 }
  0x10   : > { %s2419_s16 = smov (!%p243_p5, %s1744_s16), 1  ;;  %s2421_s24 = smov (!%p245_p6, %s242_s24), 33 }
  0x11   : > { %s1673_s27 = smul.u32 34, %s2419_s16  ;;  %s2423_s15 = smov (!%p254_p7, %s1740_s15), 1 }
  0x12   : > { %s1675_s29 = smul.u32 6, %s2419_s16 }
  0x13   : > { %s1840_s28 = sadd.s32 %s1673_s27, %s2421_s24  ;;  %s1674_s5 = smul.u32 3, %s2423_s15 }
  0x14   : > { %s1308_s30 = sshll.u32 %s1840_s28, 3 }
  0x15   : > { %s1848_s8 = scalar_lea.vmem %s2403_s0, %s1308_s30  ;;  %s258_s11 = sadd.s32 %s1675_s29, %s1674_s5 }
  0x16   : > { %v271_v4 = vld [vmem:[%s1848_s8] sm:$0xff]  ;;  %v272_v5 = vld [vmem:[%s1848_s8 + $0x8] sm:$0xff]  ;;  %v1856_v6 = vld [vmem:[%s1848_s8 + $0x10] sm:$0xff]  ;;  %s1309_s14 = sshll.u32 %s258_s11, 3  ;;  %s2319_s27 = scalar_lea.vmem %s2407_s4, %s1308_s30 }
  0x17   : > { %v315_v7 = vrot.slane %v271_v4, 1  ;;  %v316_v8 = vrot.slane %v272_v5, 1  ;;  %1517 = vmatmul.mubr.msk.f32.vlgmr.msra.gmra.mrb[0].mxu1 %vm350_vm2, %v271_v4  ;;  %v318_v9 = vrot.slane %v1856_v6, 1  ;;  %v1867_v11 = vld [vmem:[%s1848_s8 + $0x18] sm:$0xff]  ;;  %s260_s22 = scalar_lea.vmem %s2404_s1, %s1309_s14  ;;  %v1881_v15 = vld [vmem:[%s1848_s8 + $0x20] sm:$0xff]  ;;  %v1902_v22 = vld [vmem:[%s1848_s8 + $0x28] sm:$0xff] }
  0x18   : > { %1621 = vmatpush3.msk.msra.mxu1 %vm385_vm0, %v1367_v3  ;;  %1519 = vmatprep.mubr.msk.f32.mxu1 %vm1759_vm1, %v1758_v1  ;;  %v320_v14 = vrot.slane %v1867_v11, 1  ;;  %v1884_v16 = vld [vmem:[%s1848_s8 + $0x80] sm:$0xff]  ;;  %v322_v19 = vrot.slane %v1881_v15, 1  ;;  %v324_v25 = vrot.slane %v1902_v22, 1  ;;  %v1919_v26 = vld [vmem:[%s260_s22 + $0x8] sm:$0xff]  ;;  %v1924_v27 = vld [vmem:[%s1848_s8 + $0x30] sm:$0xff] }
  0x19   : > { %v317_v12 = vsel %vm314_vm3, %v315_v7, %v316_v8  ;;  %v319_v13 = vsel %vm314_vm3, %v316_v8, %v318_v9  ;;  %v1886_v17 = vld [vmem:[%s260_s22] sm:$0xff]  ;;  %v346_v20 = vrot.slane %v1884_v16, 1  ;;  %v730_v28 = vrot.slane %v1919_v26, 1  ;;  %v290_v29 = vld [vmem:[%s260_s22 + $0x10] sm:$0x1]  ;;  %v1940_v32 = vld [vmem:[%s1848_s8 + $0x38] sm:$0xff] }
  0x1a   : > { %1464 = vmatmul.mubr.msk.f32.vlgmr.msra.gmra.mrb[0].mxu0 %vm350_vm2, %v317_v12  ;;  %v1894_v18 = vsel %vm314_vm3, %v318_v9, %v320_v14  ;;  %v348_v21 = vrot.slane %v1886_v17, 1  ;;  %v1916_v24 = vsel %vm314_vm3, %v320_v14, %v322_v19  ;;  %v1934_v30 = vsel %vm314_vm3, %v322_v19, %v324_v25  ;;  %v1959_v40 = vld [vmem:[%s1848_s8 + $0x40] sm:$0xff]  ;;  %v1982_v45 = vld [vmem:[%s1848_s8 + $0x48] sm:$0xff]  ;;  %v1997_v48 = vld [vmem:[%s1848_s8 + $0x50] sm:$0xff] }
  0x1b   : > { %1568 = vmatpush3.msk.msra.mxu0 %vm385_vm0, %v1348_v10  ;;  %1466 = vmatprep.mubr.msk.f32.mxu0 %vm1759_vm1, %v1758_v1  ;;  %v326_v31 = vrot.slane %v1924_v27, 1  ;;  %v292_v34 = vsel %vm291_vm4, %v290_v29, 0.0  ;;  %v942_v35 = vrot.slane %v1919_v26, 2  ;;  %v328_v39 = vrot.slane %v1940_v32, 1  ;;  %v2012_v51 = vld [vmem:[%s1848_s8 + $0x58] sm:$0xff]  ;;  %v2027_v54 = vld [vmem:[%s1848_s8 + $0x60] sm:$0xff] }
  0x1c   : > { %1520 = vmatmul.mubr.msk.f32.gmra.mrb[2].mxu1 %vm350_vm2, %v272_v5  ;;  %v1909_v23 = vsel %vm314_vm3, %v346_v20, %v348_v21  ;;  %v1943_v33 = vsel %vm314_vm3, %v348_v21, %v730_v28  ;;  %v732_v36 = vrot.slane %v292_v34, 1  ;;  %v944_v37 = vrot.slane %v292_v34, 2  ;;  %v2042_v57 = vld [vmem:[%s1848_s8 + $0x68] sm:$0xff]  ;;  %v2057_v60 = vld [vmem:[%s1848_s8 + $0x70] sm:$0xff]  ;;  %v2072_v63 = vld [vmem:[%s1848_s8 + $0x78] sm:$0xff] }
  0x1d   : > { %1522 = vmatprep.mubr.msk.f32.mxu1 %vm1759_vm1, %v1758_v1  ;;  %v1953_v38 = vsel %vm314_vm3, %v324_v25, %v326_v31  ;;  %v1976_v43 = vsel %vm314_vm3, %v326_v31, %v328_v39  ;;  %v330_v44 = vrot.slane %v1959_v40, 1  ;;  %v332_v47 = vrot.slane %v1982_v45, 1 }
  0x1e   : > { %1467 = vmatmul.mubr.msk.f32.gmra.mrb[2].mxu0 %vm350_vm2, %v319_v13  ;;  %v1962_v41 = vsel %vm314_vm3, %v730_v28, %v732_v36  ;;  %v1967_v42 = vsel %vm910_vm5, %v942_v35, %v944_v37  ;;  %v334_v50 = vrot.slane %v1997_v48, 1  ;;  %v336_v53 = vrot.slane %v2012_v51, 1 }
  0x1f   : > { %1469 = vmatprep.mubr.msk.f32.mxu0 %vm1759_vm1, %v1758_v1  ;;  %v1991_v46 = vsel %vm314_vm3, %v328_v39, %v330_v44  ;;  %v2006_v49 = vsel %vm314_vm3, %v330_v44, %v332_v47  ;;  %v338_v56 = vrot.slane %v2027_v54, 1  ;;  %v340_v59 = vrot.slane %v2042_v57, 1 }
  0x20   : > { %1523 = vmatmul.mubr.msk.f32.gmra.mrb[4].mxu1 %vm350_vm2, %v1856_v6  ;;  %v2021_v52 = vsel %vm314_vm3, %v332_v47, %v334_v50  ;;  %v2036_v55 = vsel %vm314_vm3, %v334_v50, %v336_v53  ;;  %v342_v62 = vrot.slane %v2057_v60, 1  ;;  %v344_v2 = vrot.slane %v2072_v63, 1 }
  0x21   : > { %1525 = vmatprep.mubr.msk.f32.mxu1 %vm1759_vm1, %v1758_v1  ;;  %v2051_v58 = vsel %vm314_vm3, %v336_v53, %v338_v56  ;;  %v2066_v61 = vsel %vm314_vm3, %v338_v56, %v340_v59  ;;  %v911_v5 = vrot.slane %v1856_v6, 2  ;;  %v912_v7 = vrot.slane %v1867_v11, 2 }
  0x22   : > { %1470 = vmatmul.mubr.msk.f32.gmra.mrb[4].mxu0 %vm350_vm2, %v1894_v18  ;;  %v2081_v0 = vsel %vm314_vm3, %v340_v59, %v342_v62  ;;  %v2093_v3 = vsel %vm314_vm3, %v342_v62, %v344_v2  ;;  %v2106_v4 = vsel %vm314_vm3, %v344_v2, %v346_v20  ;;  %v914_v6 = vrot.slane %v1881_v15, 2 }
  0x23   : > { %1472 = vmatprep.mubr.msk.f32.mxu0 %vm1759_vm1, %v1758_v1  ;;  %v913_v8 = vsel %vm910_vm5, %v911_v5, %v912_v7  ;;  %v916_v10 = vrot.slane %v1902_v22, 2  ;;  %v918_v12 = vrot.slane %v1924_v27, 2  ;;  %v920_v14 = vrot.slane %v1940_v32, 2 }
  0x24   : > { %1526 = vmatmul.mubr.msk.f32.gmra.mrb[6].mxu1 %vm350_vm2, %v1867_v11  ;;  %v915_v9 = vsel %vm910_vm5, %v912_v7, %v914_v6  ;;  %v924_v20 = vrot.slane %v1982_v45, 2  ;;  %v928_v25 = vrot.slane %v2012_v51, 2  ;;  %v930_v28 = vrot.slane %v2027_v54, 2 }
  0x25   : > { %1528 = vmatprep.mubr.msk.f32.mxu1 %vm1759_vm1, %v1758_v1  ;;  %v917_v11 = vsel %vm910_vm5, %v914_v6, %v916_v10  ;;  %v919_v13 = vsel %vm910_vm5, %v916_v10, %v918_v12  ;;  %v936_v36 = vrot.slane %v2072_v63, 2 }
  0x26   : > { %1473 = vmatmul.mubr.msk.f32.gmra.mrb[6].mxu0 %vm350_vm2, %v1916_v24  ;;  %v931_v29 = vsel %vm910_vm5, %v928_v25, %v930_v28 }
  0x27   : > { %1475 = vmatprep.mubr.msk.f32.mxu0 %vm1759_vm1, %v1758_v1 }
  0x28   : > { %1529 = vmatmul.mubr.msk.f32.gmra.mrb[8].mxu1 %vm350_vm2, %v1881_v15  ;;  %v921_v15 = vsel %vm910_vm5, %v918_v12, %v920_v14 }
  0x29   : > { %1531 = vmatprep.mubr.msk.f32.mxu1 %vm1759_vm1, %v1758_v1 }
  0x2a   : > { %1476 = vmatmul.mubr.msk.f32.gmra.mrb[8].mxu0 %vm350_vm2, %v1934_v30 }
  0x2b   : > { %1478 = vmatprep.mubr.msk.f32.mxu0 %vm1759_vm1, %v1758_v1 }
  0x2c   : > { %1532 = vmatmul.mubr.msk.f32.gmra.mrb[10].mxu1 %vm350_vm2, %v1902_v22  ;;  %v926_v22 = vrot.slane %v1997_v48, 2 }
  0x2d   : > { %1534 = vmatprep.mubr.msk.f32.mxu1 %vm1759_vm1, %v1758_v1 }
  0x2e   : > { %1479 = vmatmul.mubr.msk.f32.gmra.mrb[10].mxu0 %vm350_vm2, %v1953_v38 }
  0x2f   : > { %1481 = vmatprep.mubr.msk.f32.mxu0 %vm1759_vm1, %v1758_v1 }
  0x30   : > { %1535 = vmatmul.mubr.msk.f32.gmra.mrb[12].mxu1 %vm350_vm2, %v1924_v27  ;;  %v929_v27 = vsel %vm910_vm5, %v926_v22, %v928_v25 }
  0x31   : > { %1537 = vmatprep.mubr.msk.f32.mxu1 %vm1759_vm1, %v1758_v1 }
  0x32   : > { %1482 = vmatmul.mubr.msk.f32.gmra.mrb[12].mxu0 %vm350_vm2, %v1976_v43 }
  0x33   : > { %1484 = vmatprep.mubr.msk.f32.mxu0 %vm1759_vm1, %v1758_v1 }
  0x34   : > { %1538 = vmatmul.mubr.msk.f32.gmra.mrb[14].mxu1 %vm350_vm2, %v1940_v32  ;;  %v934_v32 = vrot.slane %v2057_v60, 2 }
  0x35   : > { %1540 = vmatprep.mubr.msk.f32.mxu1 %vm1759_vm1, %v1758_v1 }
  0x36   : > { %1485 = vmatmul.mubr.msk.f32.gmra.mrb[14].mxu0 %vm350_vm2, %v1991_v46  ;;  %v937_v37 = vsel %vm910_vm5, %v934_v32, %v936_v36 }
  0x37   : > { %1487 = vmatprep.mubr.msk.f32.mxu0 %vm1759_vm1, %v1758_v1 }
  0x38   : > { %1541 = vmatmul.mubr.msk.f32.gmra.mrb[16].mxu1 %vm350_vm2, %v1959_v40 }
  0x39   : > { %1543 = vmatprep.mubr.msk.f32.mxu1 %vm1759_vm1, %v1758_v1 }
  0x3a   : > { %1488 = vmatmul.mubr.msk.f32.gmra.mrb[16].mxu0 %vm350_vm2, %v2006_v49 }
  0x3b   : > { %1490 = vmatprep.mubr.msk.f32.mxu0 %vm1759_vm1, %v1758_v1 }
  0x3c   : > { %1544 = vmatmul.mubr.msk.f32.gmra.mrb[18].mxu1 %vm350_vm2, %v1982_v45 }
  0x3d   : > { %1546 = vmatprep.mubr.msk.f32.mxu1 %vm1759_vm1, %v1758_v1 }
  0x3e   : > { %1491 = vmatmul.mubr.msk.f32.gmra.mrb[18].mxu0 %vm350_vm2, %v2021_v52 }
  0x3f   : > { %1493 = vmatprep.mubr.msk.f32.mxu0 %vm1759_vm1, %v1758_v1 }
  0x40   : > { %1547 = vmatmul.mubr.msk.f32.gmra.mrb[20].mxu1 %vm350_vm2, %v1997_v48 }
  0x41   : > { %1549 = vmatprep.mubr.msk.f32.mxu1 %vm1759_vm1, %v1758_v1 }
  0x42   : > { %1494 = vmatmul.mubr.msk.f32.gmra.mrb[20].mxu0 %vm350_vm2, %v2036_v55 }
  0x43   : > { %1496 = vmatprep.mubr.msk.f32.mxu0 %vm1759_vm1, %v1758_v1 }
  0x44   : > { %1550 = vmatmul.mubr.msk.f32.gmra.mrb[22].mxu1 %vm350_vm2, %v2012_v51 }
  0x45   : > { %1552 = vmatprep.mubr.msk.f32.mxu1 %vm1759_vm1, %v1758_v1 }
  0x46   : > { %1497 = vmatmul.mubr.msk.f32.gmra.mrb[22].mxu0 %vm350_vm2, %v2051_v58 }
  0x47   : > { %1499 = vmatprep.mubr.msk.f32.mxu0 %vm1759_vm1, %v1758_v1 }
  0x48   : > { %1553 = vmatmul.mubr.msk.f32.gmra.mrb[24].mxu1 %vm350_vm2, %v2027_v54 }
  0x49   : > { %1555 = vmatprep.mubr.msk.f32.mxu1 %vm1759_vm1, %v1758_v1 }
  0x4a   : > { %1500 = vmatmul.mubr.msk.f32.gmra.mrb[24].mxu0 %vm350_vm2, %v2066_v61 }
  0x4b   : > { %1502 = vmatprep.mubr.msk.f32.mxu0 %vm1759_vm1, %v1758_v1 }
  0x4c   : > { %1556 = vmatmul.mubr.msk.f32.gmra.mrb[26].mxu1 %vm350_vm2, %v2042_v57 }
  0x4d   : > { %1558 = vmatprep.mubr.msk.f32.mxu1 %vm1759_vm1, %v1758_v1 }
  0x4e   : > { %1503 = vmatmul.mubr.msk.f32.gmra.mrb[26].mxu0 %vm350_vm2, %v2081_v0 }
  0x4f   : > { %1505 = vmatprep.mubr.msk.f32.mxu0 %vm1759_vm1, %v1758_v1 }
  0x50   : > { %1559 = vmatmul.mubr.msk.f32.gmra.mrb[28].mxu1 %vm350_vm2, %v2057_v60 }
  0x51   : > { %1561 = vmatprep.mubr.msk.f32.mxu1 %vm1759_vm1, %v1758_v1 }
  0x52   : > { %1506 = vmatmul.mubr.msk.f32.gmra.mrb[28].mxu0 %vm350_vm2, %v2093_v3 }
  0x53   : > { %1508 = vmatprep.mubr.msk.f32.mxu0 %vm1759_vm1, %v1758_v1 }
  0x54   : > { %1562 = vmatmul.mubr.msk.f32.gmra.mrb[30].mxu1 %vm350_vm2, %v2072_v63 }
  0x55   : > { %1564 = vmatprep.mubr.msk.f32.mxu1 %vm1759_vm1, %v1758_v1 }
  0x56   : > { %1509 = vmatmul.mubr.msk.f32.gmra.mrb[30].mxu0 %vm350_vm2, %v2106_v4 }
  0x57   : > { %1511 = vmatprep.mubr.msk.f32.mxu0 %vm1759_vm1, %v1758_v1 }
  0x58   : > { %1565 = vmatmul.mubr.msk.f32.gmra.mrb[32].mxu1 %vm350_vm2, %v1884_v16 }
  0x59   : > { %1622 = vmatprep.mubr.msk.f32.mxu1 %vm1759_vm1, %v1758_v1 }
  0x5a   : > { %1512 = vmatmul.mubr.msk.f32.gmra.mrb[32].mxu0 %vm350_vm2, %v1909_v23 }
  0x5b   : > { %1569 = vmatprep.mubr.msk.f32.mxu0 %vm1759_vm1, %v1758_v1 }
  0x5c   : > { %1623 = vmatmul.mubr.msk.f32.vlgmr.msra.gmra.mrb[34].mxu1 %vm350_vm2, %v913_v8 }
  0x5d   : > { %1625 = vmatprep.mubr.msk.f32.mxu1 %vm1759_vm1, %v1758_v1 }
  0x5e   : > { %1570 = vmatmul.mubr.msk.f32.vlgmr.msra.gmra.mrb[34].mxu0 %vm350_vm2, %v1894_v18  ;;  %v922_v18 = vrot.slane %v1959_v40, 2  ;;  %v940_v40 = vrot.slane %v1886_v17, 2 }
  0x5f   : > { %1572 = vmatprep.mubr.msk.f32.mxu0 %vm1759_vm1, %v1758_v1 }
  0x60   : > { %1626 = vmatmul.mubr.msk.f32.gmra.mrb[36].mxu1 %vm350_vm2, %v915_v9  ;;  %v923_v19 = vsel %vm910_vm5, %v920_v14, %v922_v18  ;;  %v925_v21 = vsel %vm910_vm5, %v922_v18, %v924_v20  ;;  %v943_v17 = vsel %vm910_vm5, %v940_v40, %v942_v35 }
  0x61   : > { %1628 = vmatprep.mubr.msk.f32.mxu1 %vm1759_vm1, %v1758_v1 }
  0x62   : > { %1573 = vmatmul.mubr.msk.f32.gmra.mrb[36].mxu0 %vm350_vm2, %v1916_v24  ;;  %v927_v24 = vsel %vm910_vm5, %v924_v20, %v926_v22 }
  0x63   : > { %1575 = vmatprep.mubr.msk.f32.mxu0 %vm1759_vm1, %v1758_v1 }
  0x64   : > { %1629 = vmatmul.mubr.msk.f32.gmra.mrb[38].mxu1 %vm350_vm2, %v917_v11 }
  0x65   : > { %1631 = vmatprep.mubr.msk.f32.mxu1 %vm1759_vm1, %v1758_v1 }
  0x66   : > { %1576 = vmatmul.mubr.msk.f32.gmra.mrb[38].mxu0 %vm350_vm2, %v1934_v30  ;;  %v932_v30 = vrot.slane %v2042_v57, 2 }
  0x67   : > { %1578 = vmatprep.mubr.msk.f32.mxu0 %vm1759_vm1, %v1758_v1 }
  0x68   : > { %1632 = vmatmul.mubr.msk.f32.gmra.mrb[40].mxu1 %vm350_vm2, %v919_v13  ;;  %v933_v31 = vsel %vm910_vm5, %v930_v28, %v932_v30  ;;  %v935_v34 = vsel %vm910_vm5, %v932_v30, %v934_v32 }
  0x69   : > { %1634 = vmatprep.mubr.msk.f32.mxu1 %vm1759_vm1, %v1758_v1 }
  0x6a   : > { %1579 = vmatmul.mubr.msk.f32.gmra.mrb[40].mxu0 %vm350_vm2, %v1953_v38  ;;  %v938_v38 = vrot.slane %v1884_v16, 2 }
  0x6b   : > { %1581 = vmatprep.mubr.msk.f32.mxu0 %vm1759_vm1, %v1758_v1 }
  0x6c   : > { %1635 = vmatmul.mubr.msk.f32.gmra.mrb[42].mxu1 %vm350_vm2, %v921_v15  ;;  %v939_v39 = vsel %vm910_vm5, %v936_v36, %v938_v38  ;;  %v941_v16 = vsel %vm910_vm5, %v938_v38, %v940_v40 }
  0x6d   : > { %1637 = vmatprep.mubr.msk.f32.mxu1 %vm1759_vm1, %v1758_v1 }
  0x6e   : > { %1582 = vmatmul.mubr.msk.f32.gmra.mrb[42].mxu0 %vm350_vm2, %v1976_v43 }
  0x6f   : > { %1584 = vmatprep.mubr.msk.f32.mxu0 %vm1759_vm1, %v1758_v1 }
  0x70   : > { %1638 = vmatmul.mubr.msk.f32.gmra.mrb[44].mxu1 %vm350_vm2, %v923_v19 }
  0x71   : > { %1640 = vmatprep.mubr.msk.f32.mxu1 %vm1759_vm1, %v1758_v1 }
  0x72   : > { %1585 = vmatmul.mubr.msk.f32.gmra.mrb[44].mxu0 %vm350_vm2, %v1991_v46 }
  0x73   : > { %1587 = vmatprep.mubr.msk.f32.mxu0 %vm1759_vm1, %v1758_v1 }
  0x74   : > { %1641 = vmatmul.mubr.msk.f32.gmra.mrb[46].mxu1 %vm350_vm2, %v925_v21 }
  0x75   : > { %1643 = vmatprep.mubr.msk.f32.mxu1 %vm1759_vm1, %v1758_v1 }
  0x76   : > { %1588 = vmatmul.mubr.msk.f32.gmra.mrb[46].mxu0 %vm350_vm2, %v2006_v49 }
  0x77   : > { %1590 = vmatprep.mubr.msk.f32.mxu0 %vm1759_vm1, %v1758_v1 }
  0x78   : > { %1644 = vmatmul.mubr.msk.f32.gmra.mrb[48].mxu1 %vm350_vm2, %v927_v24 }
  0x79   : > { %1646 = vmatprep.mubr.msk.f32.mxu1 %vm1759_vm1, %v1758_v1 }
  0x7a   : > { %1591 = vmatmul.mubr.msk.f32.gmra.mrb[48].mxu0 %vm350_vm2, %v2021_v52 }
  0x7b   : > { %1593 = vmatprep.mubr.msk.f32.mxu0 %vm1759_vm1, %v1758_v1 }
  0x7c   : > { %1647 = vmatmul.mubr.msk.f32.gmra.mrb[50].mxu1 %vm350_vm2, %v929_v27 }
  0x7d   : > { %1649 = vmatprep.mubr.msk.f32.mxu1 %vm1759_vm1, %v1758_v1 }
  0x7e   : > { %1594 = vmatmul.mubr.msk.f32.gmra.mrb[50].mxu0 %vm350_vm2, %v2036_v55 }
  0x7f   : > { %1596 = vmatprep.mubr.msk.f32.mxu0 %vm1759_vm1, %v1758_v1 }
  0x80   : > { %1650 = vmatmul.mubr.msk.f32.gmra.mrb[52].mxu1 %vm350_vm2, %v931_v29 }
  0x81   : > { %1652 = vmatprep.mubr.msk.f32.mxu1 %vm1759_vm1, %v1758_v1 }
  0x82   : > { %1597 = vmatmul.mubr.msk.f32.gmra.mrb[52].mxu0 %vm350_vm2, %v2051_v58 }
  0x83   : > { %1599 = vmatprep.mubr.msk.f32.mxu0 %vm1759_vm1, %v1758_v1 }
  0x84   : > { %1653 = vmatmul.mubr.msk.f32.gmra.mrb[54].mxu1 %vm350_vm2, %v933_v31 }
  0x85   : > { %1655 = vmatprep.mubr.msk.f32.mxu1 %vm1759_vm1, %v1758_v1 }
  0x86   : > { %1600 = vmatmul.mubr.msk.f32.gmra.mrb[54].mxu0 %vm350_vm2, %v2066_v61 }
  0x87   : > { %1602 = vmatprep.mubr.msk.f32.mxu0 %vm1759_vm1, %v1758_v1 }
  0x88   : > { %1656 = vmatmul.mubr.msk.f32.gmra.mrb[56].mxu1 %vm350_vm2, %v935_v34 }
  0x89   : > { %1658 = vmatprep.mubr.msk.f32.mxu1 %vm1759_vm1, %v1758_v1 }
  0x8a   : > { %1603 = vmatmul.mubr.msk.f32.gmra.mrb[56].mxu0 %vm350_vm2, %v2081_v0 }
  0x8b   : > { %1605 = vmatprep.mubr.msk.f32.mxu0 %vm1759_vm1, %v1758_v1 }
  0x8c   : > { %1659 = vmatmul.mubr.msk.f32.gmra.mrb[58].mxu1 %vm350_vm2, %v937_v37 }
  0x8d   : > { %1661 = vmatprep.mubr.msk.f32.mxu1 %vm1759_vm1, %v1758_v1 }
  0x8e   : > { %1606 = vmatmul.mubr.msk.f32.gmra.mrb[58].mxu0 %vm350_vm2, %v2093_v3 }
  0x8f   : > { %1608 = vmatprep.mubr.msk.f32.mxu0 %vm1759_vm1, %v1758_v1 }
  0x90   : > { %1662 = vmatmul.mubr.msk.f32.gmra.mrb[60].mxu1 %vm350_vm2, %v939_v39 }
  0x91   : > { %1664 = vmatprep.mubr.msk.f32.mxu1 %vm1759_vm1, %v1758_v1 }
  0x92   : > { %1609 = vmatmul.mubr.msk.f32.gmra.mrb[60].mxu0 %vm350_vm2, %v2106_v4 }
  0x93   : > { %1611 = vmatprep.mubr.msk.f32.mxu0 %vm1759_vm1, %v1758_v1 }
  0x94   : > { %1665 = vmatmul.mubr.msk.f32.gmra.mrb[62].mxu1 %vm350_vm2, %v941_v16 }
  0x95   : > { %1667 = vmatprep.mubr.msk.f32.mxu1 %vm1759_vm1, %v1758_v1 }
  0x96   : > { %1612 = vmatmul.mubr.msk.f32.gmra.mrb[62].mxu0 %vm350_vm2, %v1909_v23 }
  0x97   : > { %1614 = vmatprep.mubr.msk.f32.mxu0 %vm1759_vm1, %v1758_v1 }
  0x98   : > { %1668 = vmatmul.mubr.msk.f32.gmra.mrb[64].mxu1 %vm350_vm2, %v943_v17 }
  0x99   : > { %1670 = vmatprep.mubr.msk.f32.mxu1 %vm1759_vm1, %v1758_v1 }
  0x9a   : > { %1615 = vmatmul.mubr.msk.f32.gmra.mrb[64].mxu0 %vm350_vm2, %v1943_v33 }
  0x9b   : > { %1617 = vmatprep.mubr.msk.f32.mxu0 %vm1759_vm1, %v1758_v1 }
  0x9c   : > { %1671 = vmatmul.mubr.msk.f32.gmra.mrb[66].mxu1 %vm350_vm2, %v1967_v42 }
  0x9e   : > { %1618 = vmatmul.mubr.msk.f32.gmra.mrb[66].mxu0 %vm350_vm2, %v1962_v41 }
  0xea   : > { %v642_v23 = vpop.f32.mrb[0].mxu1 }
  0xeb   : > { %v1518_v26 = vpop.f32.mrb[1].mxu1 }
  0xed   : > { %v455_v35 = vpop.f32.mrb[0].mxu0 }
  0xee   : > { %v2274_v43 = vadd.f32 %v642_v23, %v455_v35  ;;  %v1465_v44 = vpop.f32.mrb[1].mxu0 }
  0xef   : > { %v647_v45 = vpop.f32.mrb[2].mxu1 }
  0xf0   : > { %v1521_v46 = vpop.f32.mrb[3].mxu1 }
  0xf1   : > { %v460_v47 = vpop.f32.mrb[2].mxu0 }
  0xf2   : > { %v2276_v48 = vadd.f32 %v647_v45, %v460_v47  ;;  %v1468_v33 = vpop.f32.mrb[3].mxu0 }
  0xf3   : > { %v652_v49 = vpop.f32.mrb[4].mxu1 }
  0xf4   : > { %v1524_v1 = vpop.f32.mrb[5].mxu1 }
  0xf5   : > { %v465_v50 = vpop.f32.mrb[4].mxu0 }
  0xf6   : > { %v2278_v51 = vadd.f32 %v652_v49, %v465_v50  ;;  %v1471_v42 = vpop.f32.mrb[5].mxu0 }
  0xf7   : > { %v657_v52 = vpop.f32.mrb[6].mxu1 }
  0xf8   : > { %v1527_v41 = vpop.f32.mrb[7].mxu1 }
  0xf9   : > { %v470_v53 = vpop.f32.mrb[6].mxu0 }
  0xfa   : > { %v2280_v54 = vadd.f32 %v657_v52, %v470_v53  ;;  %v1474_v55 = vpop.f32.mrb[7].mxu0 }
  0xfb   : > { %v662_v56 = vpop.f32.mrb[8].mxu1 }
  0xfc   : > { %v1530_v57 = vpop.f32.mrb[9].mxu1 }
  0xfd   : > { %v475_v58 = vpop.f32.mrb[8].mxu0 }
  0xfe   : > { %v2282_v59 = vadd.f32 %v662_v56, %v475_v58  ;;  %v1477_v60 = vpop.f32.mrb[9].mxu0 }
  0xff   : > { %v667_v61 = vpop.f32.mrb[10].mxu1 }
 0x100   : > { %v1533_v62 = vpop.f32.mrb[11].mxu1 }
 0x101   : > { %v480_v63 = vpop.f32.mrb[10].mxu0 }
 0x102   : > { %v2284_v0 = vadd.f32 %v667_v61, %v480_v63  ;;  %v1480_v2 = vpop.f32.mrb[11].mxu0 }
 0x103   : > { %v672_v3 = vpop.f32.mrb[12].mxu1 }
 0x104   : > { %v1536_v4 = vpop.f32.mrb[13].mxu1 }
 0x105   : > { %v485_v5 = vpop.f32.mrb[12].mxu0 }
 0x106   : > { %v2286_v7 = vadd.f32 %v672_v3, %v485_v5  ;;  %v1483_v8 = vpop.f32.mrb[13].mxu0  ;;  %v2312_v5 = vld [vmem:[%s2406_s3] ss:$0 sm:$0xff] }
 0x107   : > { %v677_v6 = vpop.f32.mrb[14].mxu1 }
 0x108   : > { %v1539_v9 = vpop.f32.mrb[15].mxu1 }
 0x109   : > { %v490_v10 = vpop.f32.mrb[14].mxu0 }
 0x10a   : > { %v2288_v11 = vadd.f32 %v677_v6, %v490_v10  ;;  %v1486_v12 = vpop.f32.mrb[15].mxu0 }
 0x10b   : > { %v682_v13 = vpop.f32.mrb[16].mxu1 }
 0x10c   : > { %v1542_v14 = vpop.f32.mrb[17].mxu1 }
 0x10d   : > { %v495_v15 = vpop.f32.mrb[16].mxu0 }
 0x10e   : > { %v2290_v18 = vadd.f32 %v682_v13, %v495_v15  ;;  %v1489_v19 = vpop.f32.mrb[17].mxu0 }
 0x10f   : > { %v687_v20 = vpop.f32.mrb[18].mxu1 }
 0x110   : > { %v1545_v21 = vpop.f32.mrb[19].mxu1 }
 0x111   : > { %v500_v22 = vpop.f32.mrb[18].mxu0 }
 0x112   : > { %v2292_v24 = vadd.f32 %v687_v20, %v500_v22  ;;  %v1492_v25 = vpop.f32.mrb[19].mxu0 }
 0x113   : > { %v692_v27 = vpop.f32.mrb[20].mxu1 }
 0x114   : > { %v1548_v28 = vpop.f32.mrb[21].mxu1 }
 0x115   : > { %v505_v29 = vpop.f32.mrb[20].mxu0 }
 0x116   : > { %v2294_v30 = vadd.f32 %v692_v27, %v505_v29  ;;  %v1495_v31 = vpop.f32.mrb[21].mxu0 }
 0x117   : > { %v697_v32 = vpop.f32.mrb[22].mxu1 }
 0x118   : > { %v1551_v34 = vpop.f32.mrb[23].mxu1 }
 0x119   : > { %v510_v36 = vpop.f32.mrb[22].mxu0 }
 0x11a   : > { %v2296_v37 = vadd.f32 %v697_v32, %v510_v36  ;;  %v1498_v38 = vpop.f32.mrb[23].mxu0 }
 0x11b   : > { %v702_v39 = vpop.f32.mrb[24].mxu1 }
 0x11c   : > { %v1554_v40 = vpop.f32.mrb[25].mxu1 }
 0x11d   : > { %v515_v16 = vpop.f32.mrb[24].mxu0 }
 0x11e   : > { %v2298_v17 = vadd.f32 %v702_v39, %v515_v16  ;;  %v1501_v23 = vpop.f32.mrb[25].mxu0 }
 0x11f   : > { %v707_v26 = vpop.f32.mrb[26].mxu1 }
 0x120   : > { %v1557_v35 = vpop.f32.mrb[27].mxu1 }
 0x121   : > { %v520_v44 = vpop.f32.mrb[26].mxu0 }
 0x122   : > { %v2300_v45 = vadd.f32 %v707_v26, %v520_v44  ;;  %v1504_v46 = vpop.f32.mrb[27].mxu0 }
 0x123   : > { %v712_v47 = vpop.f32.mrb[28].mxu1 }
 0x124   : > { %v1560_v33 = vpop.f32.mrb[29].mxu1 }
 0x125   : > { %v525_v49 = vpop.f32.mrb[28].mxu0 }
 0x126   : > { %v2302_v1 = vadd.f32 %v712_v47, %v525_v49  ;;  %v1507_v50 = vpop.f32.mrb[29].mxu0 }
 0x127   : > { %v717_v42 = vpop.f32.mrb[30].mxu1 }
 0x128   : > { %v1563_v52 = vpop.f32.mrb[31].mxu1 }
 0x129   : > { %v530_v41 = vpop.f32.mrb[30].mxu0 }
 0x12a   : > { %v2304_v53 = vadd.f32 %v717_v42, %v530_v41  ;;  %v1510_v55 = vpop.f32.mrb[31].mxu0 }
 0x12b   : > { %v722_v56 = vpop.f32.mrb[32].mxu1 }
 0x12c   : > { %v1566_v57 = vpop.f32.mrb[33].mxu1 }
 0x12d   : > { %v535_v58 = vpop.f32.mrb[32].mxu0 }
 0x12e   : > { %v2306_v60 = vadd.f32 %v722_v56, %v535_v58  ;;  %v1513_v61 = vpop.f32.mrb[33].mxu0 }
 0x12f   : > { %v1049_v62 = vpop.f32.mrb[34].mxu1 }
 0x130   : > { %v1624_v63 = vpop.f32.mrb[35].mxu1 }
 0x131   : > { %v807_v2 = vpop.f32.mrb[34].mxu0 }
 0x132   : > { %v891_v3 = vadd.f32 %v807_v2, %v2274_v43  ;;  %v1571_v4 = vpop.f32.mrb[35].mxu0 }
 0x133   : > { %v1054_v8 = vpop.f32.mrb[36].mxu1 }
 0x134   : > { %v1133_v6 = vadd.f32 %v1049_v62, %v891_v3  ;;  %v1627_v9 = vpop.f32.mrb[37].mxu1 }
 0x135   : > { %v812_v10 = vpop.f32.mrb[36].mxu0 }
 0x136   : > { %v1157_v43 = vadd.f32 %v2312_v5, %v1133_v6  ;;  %v892_v12 = vadd.f32 %v812_v10, %v2276_v48  ;;  %v1574_v13 = vpop.f32.mrb[37].mxu0 }
 0x137   : > { %v1059_v14 = vpop.f32.mrb[38].mxu1 }
 0x138   : > { %1175 = vst.msk [vmem:[%s2319_s27] sm:$0xff] %vm1174_vm6, %v1157_v43  ;;  %v1134_v15 = vadd.f32 %v1054_v8, %v892_v12  ;;  %v1630_v19 = vpop.f32.mrb[39].mxu1 }
 0x139   : > { %v817_v20 = vpop.f32.mrb[38].mxu0 }
 0x13a   : > { %v1158_v21 = vadd.f32 %v2312_v5, %v1134_v15  ;;  %v893_v22 = vadd.f32 %v817_v20, %v2278_v51  ;;  %v1577_v25 = vpop.f32.mrb[39].mxu0 }
 0x13b   : > { %v1064_v27 = vpop.f32.mrb[40].mxu1 }
 0x13c   : > { %1176 = vst.msk [vmem:[%s2319_s27 + $0x8] sm:$0xff] %vm1174_vm6, %v1158_v21  ;;  %v1135_v28 = vadd.f32 %v1059_v14, %v893_v22  ;;  %v1633_v29 = vpop.f32.mrb[41].mxu1 }
 0x13d   : > { %v822_v48 = vpop.f32.mrb[40].mxu0 }
 0x13e   : > { %v1159_v31 = vadd.f32 %v2312_v5, %v1135_v28  ;;  %v894_v32 = vadd.f32 %v822_v48, %v2280_v54  ;;  %v1580_v34 = vpop.f32.mrb[41].mxu0 }
 0x13f   : > { %v1069_v36 = vpop.f32.mrb[42].mxu1 }
 0x140   : > { %1177 = vst.msk [vmem:[%s2319_s27 + $0x10] sm:$0xff] %vm1174_vm6, %v1159_v31  ;;  %v1136_v38 = vadd.f32 %v1064_v27, %v894_v32  ;;  %v1636_v39 = vpop.f32.mrb[43].mxu1 }
 0x141   : > { %v827_v51 = vpop.f32.mrb[42].mxu0 }
 0x142   : > { %v1160_v40 = vadd.f32 %v2312_v5, %v1136_v38  ;;  %v895_v16 = vadd.f32 %v827_v51, %v2282_v59  ;;  %v1583_v23 = vpop.f32.mrb[43].mxu0 }
 0x143   : > { %v1074_v26 = vpop.f32.mrb[44].mxu1 }
 0x144   : > { %1178 = vst.msk [vmem:[%s2319_s27 + $0x18] sm:$0xff] %vm1174_vm6, %v1160_v40  ;;  %v1137_v35 = vadd.f32 %v1069_v36, %v895_v16  ;;  %v1639_v44 = vpop.f32.mrb[45].mxu1 }
 0x145   : > { %v832_v54 = vpop.f32.mrb[44].mxu0 }
 0x146   : > { %v1161_v46 = vadd.f32 %v2312_v5, %v1137_v35  ;;  %v896_v47 = vadd.f32 %v832_v54, %v2284_v0  ;;  %v1586_v33 = vpop.f32.mrb[45].mxu0 }
 0x147   : > { %v1079_v49 = vpop.f32.mrb[46].mxu1 }
 0x148   : > { %1179 = vst.msk [vmem:[%s2319_s27 + $0x20] sm:$0xff] %vm1174_vm6, %v1161_v46  ;;  %v1138_v50 = vadd.f32 %v1074_v26, %v896_v47  ;;  %v1642_v42 = vpop.f32.mrb[47].mxu1 }
 0x149   : > { %v837_v59 = vpop.f32.mrb[46].mxu0 }
 0x14a   : > { %v1162_v52 = vadd.f32 %v2312_v5, %v1138_v50  ;;  %v897_v41 = vadd.f32 %v837_v59, %v2286_v7  ;;  %v1589_v55 = vpop.f32.mrb[47].mxu0 }
 0x14b   : > { %v1084_v56 = vpop.f32.mrb[48].mxu1 }
 0x14c   : > { %1180 = vst.msk [vmem:[%s2319_s27 + $0x28] sm:$0xff] %vm1174_vm6, %v1162_v52  ;;  %v1139_v57 = vadd.f32 %v1079_v49, %v897_v41  ;;  %v1645_v58 = vpop.f32.mrb[49].mxu1 }
 0x14d   : > { %v842_v0 = vpop.f32.mrb[48].mxu0 }
 0x14e   : > { %v1163_v61 = vadd.f32 %v2312_v5, %v1139_v57  ;;  %v898_v62 = vadd.f32 %v842_v0, %v2288_v11  ;;  %v1592_v63 = vpop.f32.mrb[49].mxu0 }
 0x14f   : > { %v1089_v2 = vpop.f32.mrb[50].mxu1 }
 0x150   : > { %1181 = vst.msk [vmem:[%s2319_s27 + $0x30] sm:$0xff] %vm1174_vm6, %v1163_v61  ;;  %v1140_v3 = vadd.f32 %v1084_v56, %v898_v62  ;;  %v1648_v4 = vpop.f32.mrb[51].mxu1 }
 0x151   : > { %v847_v7 = vpop.f32.mrb[50].mxu0 }
 0x152   : > { %v1164_v8 = vadd.f32 %v2312_v5, %v1140_v3  ;;  %v899_v6 = vadd.f32 %v847_v7, %v2290_v18  ;;  %v1595_v9 = vpop.f32.mrb[51].mxu0 }
 0x153   : > { %v1094_v10 = vpop.f32.mrb[52].mxu1 }
 0x154   : > { %1182 = vst.msk [vmem:[%s2319_s27 + $0x38] sm:$0xff] %vm1174_vm6, %v1164_v8  ;;  %v1141_v43 = vadd.f32 %v1089_v2, %v899_v6  ;;  %v1651_v12 = vpop.f32.mrb[53].mxu1 }
 0x155   : > { %v852_v11 = vpop.f32.mrb[52].mxu0 }
 0x156   : > { %v1165_v13 = vadd.f32 %v2312_v5, %v1141_v43  ;;  %v900_v14 = vadd.f32 %v852_v11, %v2292_v24  ;;  %v1598_v15 = vpop.f32.mrb[53].mxu0 }
 0x157   : > { %v1099_v19 = vpop.f32.mrb[54].mxu1 }
 0x158   : > { %1183 = vst.msk [vmem:[%s2319_s27 + $0x40] sm:$0xff] %vm1174_vm6, %v1165_v13  ;;  %v1142_v20 = vadd.f32 %v1094_v10, %v900_v14  ;;  %v1654_v21 = vpop.f32.mrb[55].mxu1 }
 0x159   : > { %v857_v18 = vpop.f32.mrb[54].mxu0 }
 0x15a   : > { %v1166_v22 = vadd.f32 %v2312_v5, %v1142_v20  ;;  %v901_v25 = vadd.f32 %v857_v18, %v2294_v30  ;;  %v1601_v27 = vpop.f32.mrb[55].mxu0 }
 0x15b   : > { %v1104_v28 = vpop.f32.mrb[56].mxu1 }
 0x15c   : > { %1184 = vst.msk [vmem:[%s2319_s27 + $0x48] sm:$0xff] %vm1174_vm6, %v1166_v22  ;;  %v1143_v29 = vadd.f32 %v1099_v19, %v901_v25  ;;  %v1657_v48 = vpop.f32.mrb[57].mxu1 }
 0x15d   : > { %v862_v24 = vpop.f32.mrb[56].mxu0 }
 0x15e   : > { %v1167_v31 = vadd.f32 %v2312_v5, %v1143_v29  ;;  %v902_v32 = vadd.f32 %v862_v24, %v2296_v37  ;;  %v1604_v34 = vpop.f32.mrb[57].mxu0 }
 0x15f   : > { %v1109_v36 = vpop.f32.mrb[58].mxu1 }
 0x160   : > { %1185 = vst.msk [vmem:[%s2319_s27 + $0x50] sm:$0xff] %vm1174_vm6, %v1167_v31  ;;  %v1144_v38 = vadd.f32 %v1104_v28, %v902_v32  ;;  %v1660_v39 = vpop.f32.mrb[59].mxu1 }
 0x161   : > { %v867_v30 = vpop.f32.mrb[58].mxu0 }
 0x162   : > { %v1168_v51 = vadd.f32 %v2312_v5, %v1144_v38  ;;  %v903_v40 = vadd.f32 %v867_v30, %v2298_v17  ;;  %v1607_v16 = vpop.f32.mrb[59].mxu0 }
 0x163   : > { %v1114_v23 = vpop.f32.mrb[60].mxu1 }
 0x164   : > { %1186 = vst.msk [vmem:[%s2319_s27 + $0x58] sm:$0xff] %vm1174_vm6, %v1168_v51  ;;  %v1145_v26 = vadd.f32 %v1109_v36, %v903_v40  ;;  %v1663_v35 = vpop.f32.mrb[61].mxu1 }
 0x165   : > { %v872_v37 = vpop.f32.mrb[60].mxu0 }
 0x166   : > { %v1169_v44 = vadd.f32 %v2312_v5, %v1145_v26  ;;  %v904_v54 = vadd.f32 %v872_v37, %v2300_v45  ;;  %v1610_v46 = vpop.f32.mrb[61].mxu0 }
 0x167   : > { %v1119_v47 = vpop.f32.mrb[62].mxu1 }
 0x168   : > { %1187 = vst.msk [vmem:[%s2319_s27 + $0x60] sm:$0xff] %vm1174_vm6, %v1169_v44  ;;  %v1146_v33 = vadd.f32 %v1114_v23, %v904_v54  ;;  %v1666_v49 = vpop.f32.mrb[63].mxu1 }
 0x169   : > { %v877_v17 = vpop.f32.mrb[62].mxu0 }
 0x16a   : > { %v1170_v50 = vadd.f32 %v2312_v5, %v1146_v33  ;;  %v905_v42 = vadd.f32 %v877_v17, %v2302_v1  ;;  %v1613_v59 = vpop.f32.mrb[63].mxu0 }
 0x16b   : > { %v1124_v52 = vpop.f32.mrb[64].mxu1 }
 0x16c   : > { %1188 = vst.msk [vmem:[%s2319_s27 + $0x68] sm:$0xff] %vm1174_vm6, %v1170_v50  ;;  %v1147_v41 = vadd.f32 %v1119_v47, %v905_v42  ;;  %v1669_v55 = vpop.f32.mrb[65].mxu1 }
 0x16d   : > { %v882_v45 = vpop.f32.mrb[64].mxu0 }
 0x16e   : > { %v1171_v56 = vadd.f32 %v2312_v5, %v1147_v41  ;;  %v906_v57 = vadd.f32 %v882_v45, %v2304_v53  ;;  %v1616_v58 = vpop.f32.mrb[65].mxu0 }
 0x16f   : > { %v1129_v0 = vpop.f32.mrb[66].mxu1 }
 0x170   : > { %1189 = vst.msk [vmem:[%s2319_s27 + $0x70] sm:$0xff] %vm1174_vm6, %v1171_v56  ;;  %v1148_v61 = vadd.f32 %v1124_v52, %v906_v57  ;;  %v1672_v62 = vpop.f32.mrb[67].mxu1 }
 0x171   : > { %v887_v1 = vpop.f32.mrb[66].mxu0 }
 0x172   : > { %v1172_v63 = vadd.f32 %v2312_v5, %v1148_v61  ;;  %v907_v2 = vadd.f32 %v887_v1, %v2306_v60  ;;  %v1619_v3 = vpop.f32.mrb[67].mxu0 }
 0x174   : > { %1190 = vst.msk [vmem:[%s2319_s27 + $0x78] sm:$0xff] %vm1174_vm6, %v1172_v63  ;;  %v1149_v4 = vadd.f32 %v1129_v0, %v907_v2 }
 0x176   : > { %v1173_v7 = vadd.f32 %v2312_v5, %v1149_v4 }
 0x178   : > { %1191 = vst.msk [vmem:[%s2319_s27 + $0x80] sm:$0xff] %vm1174_vm6, %v1173_v7 }
 0x179 PF: > { %s14_s19 = sadd.s32 1, %s1756_s19   ;;  %s2408_s15 = smov %s1748_s17 }
 0x17a   : > { %p11_p8 = scmp.ge.s32.totalorder %s14_s19, 6   ;;  %s2409_s16 = smov %s1752_s18 }
 0x17b   : > { %s2410_s17 = smov %s2413_s20  ;;  %s2411_s18 = smov %s2417_s21 }
 0x17c   :  { %13 = sbr.rel (!%p11_p8) target bundleno = 3 (0x3), region = 72 }

</bundles_post_ra>
